<compile_context>
chip_gen: v6e
topology: v6e:2x2x1
jax: 0.10.0
libtpu: 0.0.40
codegen_flags: <defaults>
</compile_context>

<pallas_src>
import jax
import jax.numpy as jnp
from jax.experimental import pallas as pl
from jax.experimental.pallas import tpu as pltpu


_LANE = 128            # TPU lane width; hidden/action dims padded to this at init
_DEFAULT_TILE_B = 2048 # batch rows per grid step on the large-batch path


# ---------------------------------------------------------------------------
# Pallas kernel: fused  out = relu(x @ W1 + b1) @ W2 + b2  for one batch tile.
# NOTE: every output row depends only on its own input row — this is what makes
# the ragged-final-tile (masked store of garbage OOB rows) argument valid.
# ---------------------------------------------------------------------------
def dqn_mlp_kernel(x_ref, w1_ref, b1_ref, w2_ref, b2_ref, o_ref):
    x = x_ref[...]                                                # (tb, D)
    h = jnp.dot(x, w1_ref[...], preferred_element_type=jnp.float32)
    h = jnp.maximum(h + b1_ref[...], 0.0)                         # (tb, 128), ReLU on VPU
    o = jnp.dot(h, w2_ref[...], preferred_element_type=jnp.float32)
    o_ref[...] = o + b2_ref[...]                                  # (tb, 128) full-lane store


def _round_up(n, m):
    return -(-n // m) * m


def _dqn_forward_impl(x, w1, b1, w2, b2, *, tile_b=_DEFAULT_TILE_B):
    """x: (B, D) f32.  w1: (D, 128), b1: (1, 128), w2: (128, 128), b2: (1, 128)."""
    B, D = x.shape
    Hp = w1.shape[1]   # padded hidden  (128)
    Ap = w2.shape[1]   # padded actions (128)

    flops = 2 * B * (D * Hp + Hp * Ap)
    bytes_accessed = 4 * (B * D + D * Hp + Hp + Hp * Ap + Ap + B * Ap)
    ce = pl.CostEstimate(flops=flops, transcendentals=0,
                         bytes_accessed=bytes_accessed)

    if B <= tile_b:
        # Dominant RL-step case: single shot, no grid, no pipeline machinery.
        # (When B < 8 the implicit (8,*) sublane view over-reads; legal and
        # masked — do NOT "fix" it by padding x per call.)
        vmem = pl.BlockSpec(memory_space=pltpu.MemorySpace.VMEM)
        return pl.pallas_call(
            dqn_mlp_kernel,
            out_shape=jax.ShapeDtypeStruct((B, Ap), jnp.float32),
            in_specs=[vmem, vmem, vmem, vmem, vmem],
            out_specs=vmem,
            cost_estimate=ce,
        )(x, w1, b1, w2, b2)

    # Large-batch path: tile the batch; weights/biases stay VMEM-resident.
    tb = min(tile_b, _round_up(B, 8))
    grid = (pl.cdiv(B, tb),)
    resident = lambda i: (0, 0)   # same block every step -> no re-DMA

    return pl.pallas_call(
        dqn_mlp_kernel,
        out_shape=jax.ShapeDtypeStruct((B, Ap), jnp.float32),
        grid=grid,
        in_specs=[
            pl.BlockSpec((tb, D), lambda i: (i, 0)),   # x tile, double-buffered
            pl.BlockSpec((D, Hp), resident),           # w1
            pl.BlockSpec((1, Hp), resident),           # b1
            pl.BlockSpec((Hp, Ap), resident),          # w2
            pl.BlockSpec((1, Ap), resident),           # b2
        ],
        out_specs=pl.BlockSpec((tb, Ap), lambda i: (i, 0)),
        compiler_params=pltpu.CompilerParams(
            dimension_semantics=("parallel",)),
        cost_estimate=ce,
    )(x, w1, b1, w2, b2)


dqn_forward = jax.jit(_dqn_forward_impl, static_argnames=("tile_b",))


# ---------------------------------------------------------------------------
# Module wrapper (parameter setup + squeeze/slice glue in plain JAX)
# ---------------------------------------------------------------------------
def init_dqn_params(key, d_in, n_actions, hidden=10):
    """PyTorch-style Linear init, then one-time zero-pad of H/A dims to 128 lanes."""
    k1, k2, k3, k4 = jax.random.split(key, 4)
    bound1 = 1.0 / jnp.sqrt(jnp.float32(d_in))
    bound2 = 1.0 / jnp.sqrt(jnp.float32(hidden))
    w1 = jax.random.uniform(k1, (d_in, hidden), jnp.float32, -bound1, bound1)
    b1 = jax.random.uniform(k2, (hidden,), jnp.float32, -bound1, bound1)
    w2 = jax.random.uniform(k3, (hidden, n_actions), jnp.float32, -bound2, bound2)
    b2 = jax.random.uniform(k4, (n_actions,), jnp.float32, -bound2, bound2)

    w1p = jnp.zeros((d_in, _LANE), jnp.float32).at[:, :hidden].set(w1)
    b1p = jnp.zeros((1, _LANE), jnp.float32).at[:, :hidden].set(b1)
    w2p = jnp.zeros((_LANE, _LANE), jnp.float32).at[:hidden, :n_actions].set(w2)
    b2p = jnp.zeros((1, _LANE), jnp.float32).at[:, :n_actions].set(b2)
    return w1p, b1p, w2p, b2p


def _squeeze_input(x):
    # PyTorch's x.squeeze() removes all singleton dims.  For the known
    # (B, 1, D) layout squeeze the explicit axis; generic fallback is brittle
    # for exotic shapes (e.g. D == 1) but matches torch for the stated layout.
    if x.ndim == 3 and x.shape[1] == 1:
        x = jnp.squeeze(x, axis=1)
    else:
        x = jnp.squeeze(x)
    if x.ndim == 1:                      # single sample -> batch of 1
        return x[None, :], True
    return x, False


def dqn_solver_forward(x, params, n_actions):
    x2d, was_1d = _squeeze_input(x)
    out = dqn_forward(x2d.astype(jnp.float32), *params)
    out = out[:, :n_actions]             # drop exact-zero padded action lanes
    return out[0] if was_1d else out


# Pure-JAX reference for correctness checking (uses the same padded params).
def dqn_reference(x, params, n_actions):
    w1, b1, w2, b2 = params
    x2d, was_1d = _squeeze_input(x)
    h = jnp.maximum(x2d.astype(jnp.float32) @ w1 + b1, 0.0)
    out = (h @ w2 + b2)[:, :n_actions]
    return out[0] if was_1d else out


if __name__ == "__main__":
    key = jax.random.PRNGKey(0)
    kx, kp, kx2 = jax.random.split(key, 3)

    # input_shape = (16,), n_actions = 4, batch = 8; extra singleton dim that
    # the module's .squeeze() removes.
    B, D_in, n_actions = 8, 16, 4
    x = jax.random.normal(kx, (B, 1, D_in), jnp.float32)
    params = init_dqn_params(kp, D_in, n_actions)

    # --- dominant small-batch path (no grid) ---
    out = jax.block_until_ready(dqn_solver_forward(x, params, n_actions))
    ref = dqn_reference(x, params, n_actions)
    assert out.shape == (B, n_actions), out.shape
    assert jnp.allclose(out, ref, atol=1e-5, rtol=1e-5), "mismatch (no-grid path)"

    # --- large-batch grid path, small tile to keep the test tiny; exercises a
    #     ragged final tile (300 rows, 128-row tiles) ---
    B2 = 300
    x2 = jax.random.normal(kx2, (B2, 1, D_in), jnp.float32)
    x2d, _ = _squeeze_input(x2)
    out2 = jax.block_until_ready(
        dqn_forward(x2d.astype(jnp.float32), *params, tile_b=128))[:, :n_actions]
    ref2 = dqn_reference(x2, params, n_actions)
    assert out2.shape == (B2, n_actions), out2.shape
    assert jnp.allclose(out2, ref2, atol=1e-5, rtol=1e-5), "mismatch (grid path)"

    print("KERNEL_OK")
</pallas_src>

<mosaic_0001>
module attributes {stable_mosaic.version = 11 : i64} {
  func.func @dqn_mlp_kernel(%arg0: memref<8x16xf32, #tpu.memory_space<vmem>>, %arg1: memref<16x128xf32, #tpu.memory_space<vmem>>, %arg2: memref<1x128xf32, #tpu.memory_space<vmem>>, %arg3: memref<128x128xf32, #tpu.memory_space<vmem>>, %arg4: memref<1x128xf32, #tpu.memory_space<vmem>>, %arg5: memref<8x128xf32, #tpu.memory_space<vmem>>) attributes {dimension_semantics = [], scalar_prefetch = 0 : i64, scratch_operands = 0 : i64, tpu.core_type = #tpu.core_type<tc>} {
    %c0 = arith.constant 0 : index
    %c0_0 = arith.constant 0 : index
    %0 = vector.load %arg0[%c0, %c0_0] : memref<8x16xf32, #tpu.memory_space<vmem>>, vector<8x16xf32>
    %c0_1 = arith.constant 0 : index
    %c0_2 = arith.constant 0 : index
    %1 = vector.load %arg1[%c0_1, %c0_2] : memref<16x128xf32, #tpu.memory_space<vmem>>, vector<16x128xf32>
    %cst = arith.constant dense<0.000000e+00> : vector<8x128xf32>
    %2 = tpu.matmul %0, %1, %cst {dimension_numbers = #tpu.dot_dimension_numbers<[1], [0], [0], [1], [0, 0, 1, 1], [], []>} : vector<8x16xf32>, vector<16x128xf32>, vector<8x128xf32> -> vector<8x128xf32>
    %c0_3 = arith.constant 0 : index
    %c0_4 = arith.constant 0 : index
    %3 = vector.load %arg2[%c0_3, %c0_4] : memref<1x128xf32, #tpu.memory_space<vmem>>, vector<1x128xf32>
    %4 = vector.broadcast %3 : vector<1x128xf32> to vector<8x128xf32>
    %5 = arith.addf %2, %4 : vector<8x128xf32>
    %cst_5 = arith.constant 0.000000e+00 : f32
    %6 = vector.broadcast %cst_5 : f32 to vector<8x128xf32>
    %7 = arith.maximumf %5, %6 : vector<8x128xf32>
    %c0_6 = arith.constant 0 : index
    %c0_7 = arith.constant 0 : index
    %8 = vector.load %arg3[%c0_6, %c0_7] : memref<128x128xf32, #tpu.memory_space<vmem>>, vector<128x128xf32>
    %cst_8 = arith.constant dense<0.000000e+00> : vector<8x128xf32>
    %9 = tpu.matmul %7, %8, %cst_8 {dimension_numbers = #tpu.dot_dimension_numbers<[1], [0], [0], [1], [0, 0, 1, 1], [], []>} : vector<8x128xf32>, vector<128x128xf32>, vector<8x128xf32> -> vector<8x128xf32>
    %c0_9 = arith.constant 0 : index
    %c0_10 = arith.constant 0 : index
    %10 = vector.load %arg4[%c0_9, %c0_10] : memref<1x128xf32, #tpu.memory_space<vmem>>, vector<1x128xf32>
    %11 = vector.broadcast %10 : vector<1x128xf32> to vector<8x128xf32>
    %12 = arith.addf %9, %11 : vector<8x128xf32>
    %c0_11 = arith.constant 0 : index
    %c0_12 = arith.constant 0 : index
    %13 = vector.load %arg5[%c0_11, %c0_12] : memref<8x128xf32, #tpu.memory_space<vmem>>, vector<8x128xf32>
    tpu.vector_store %arg5[%c0_11, %c0_12], %12 {strides = array<i32>} : memref<8x128xf32, #tpu.memory_space<vmem>>, vector<8x128xf32>,
    return
  }
}

</mosaic_0001>

<bundles_post_ra>
// kernel: _dqn_forward_impl.1
= control target key start
LH: loop header
LB: loop body
LE: loop exit
PB: predicated region body
PF: predicated region fallthrough
CT: control target
= control target key end

     0   :  { %10 = vsyncpa [#allocation3], 0  ;;  %s470_s0 = inlined_call_operand.hbm [shape: f32[8,16], index: 0, kind: input, shape index: {}]   ;;  %s471_s1 = inlined_call_operand.hbm [shape: f32[16,128], index: 1, kind: input, shape index: {}]   ;;  %s472_s2 = inlined_call_operand.vmem [shape: f32[1,128], index: 2, kind: input, shape index: {}]   ;;  %s473_s3 = inlined_call_operand.hbm [shape: f32[128,128], index: 3, kind: input, shape index: {}]   ;;  %s474_s4 = inlined_call_operand.vmem [shape: f32[1,128], index: 4, kind: input, shape index: {}]   ;;  %s475_s5 = inlined_call_operand.hbm [shape: f32[8,128], index: 5, kind: output, shape index: {}]  }
   0x1   :  { %11 = vsyncpa [#allocation6], 0 }
   0x2   :  { %12 = vsyncpa [#allocation4], 0  ;;  %s414_s18 = smov [#allocation5]  }
   0x3   :  { %s28_s19 = sshll.u32 %s414_s18, 4  ;;  %s29_s19 = int_to_ptr.vmem [resolvable:$true] %s28_s19 }
   0x4   :  { %s336_s20 = scalar_lea.vmem %s29_s19, 256  ;;  %p341_p1 = scmp.lt.s32.totalorder %s29_s19, %s29_s19 }
   0x5   :  { %p337_p0 = scmp.ne.s32.totalorder %s29_s19, %s336_s20  ;;  %p342_p2 = scmp.lt.s32.totalorder %s336_s20, %s336_s20 }
   0x7   :  { %p343_p3 = por %p342_p2, %p341_p1 }
   0x9   :  { %p344_p4 = pnand %p343_p3, %p337_p0 }
   0xb   :  { %347 = shalt.err (!%p344_p4)
}
   0xc   :  { %s415_s21 = smov 128   ;;  %s416_s22 = smov 8  }
   0xd   :  { %34 = dma.hbm_to_vmem [thread:$0]  %s471_s1, 256, %s29_s19, [#allocation6], %s415_s21, %s415_s21, %s416_s22  }
   0xe   :  { %s417_s25 = smov [#allocation2]   ;;  %s418_s27 = smov [#allocation7]  }
   0xf   :  { %s19_s26 = sshll.u32 %s417_s25, 4  ;;  %s42_s28 = sshll.u32 %s418_s27, 4  ;;  %s20_s26 = int_to_ptr.vmem [resolvable:$true] %s19_s26  ;;  %s43_s28 = int_to_ptr.vmem [resolvable:$true] %s42_s28 }
  0x10   :  { %s356_s29 = scalar_lea.vmem %s20_s26, 128  ;;  %p361_p6 = scmp.lt.s32.totalorder %s20_s26, %s20_s26 }
  0x11   :  { %p357_p5 = scmp.ne.s32.totalorder %s20_s26, %s356_s29  ;;  %p362_p7 = scmp.lt.s32.totalorder %s356_s29, %s356_s29 }
  0x13   :  { %p363_p8 = por %p362_p7, %p361_p6 }
  0x15   :  { %p364_p9 = pnand %p363_p8, %p357_p5 }
  0x17   :  { %367 = shalt.err (!%p364_p9)
}
  0x18   :  { %22 = dma.hbm_to_vmem [thread:$0]  %s470_s0, 128, %s20_s26, [#allocation3]  }
  0x19   :  { %s376_s7 = scalar_lea.vmem %s43_s28, 2048  ;;  %p381_p11 = scmp.lt.s32.totalorder %s43_s28, %s43_s28 }
  0x1a   :  { %p377_p10 = scmp.ne.s32.totalorder %s43_s28, %s376_s7  ;;  %p382_p12 = scmp.lt.s32.totalorder %s376_s7, %s376_s7 }
  0x1c   :  { %p383_p13 = por %p382_p12, %p381_p11 }
  0x1e   :  { %p384_p0 = pnand %p383_p13, %p377_p10 }
  0x20   :  { %387 = shalt.err (!%p384_p0)
}
  0x21   :  { %48 = dma.hbm_to_vmem [thread:$0]  %s473_s3, 2048, %s43_s28, [#allocation6], %s415_s21, %s415_s21, %s416_s22  }
  0x22   :  { %408 = dma.done.wait [#allocation3], 128  }
  0x23   :  { %409 = vsyncadd [#allocation3], 4294967168 }
  0x24   :  { %410 = dma.done.wait [#allocation6], 2304  }
  0x25   :  { %411 = vsyncadd [#allocation6], 4294964992  ;;  %v419_v0 = vmov 0.0   ;;  %vm420_vm0 = vmmov 0   ;;  %v62_v1 = vld [vmem:[#allocation5 + $0x8] sm:$0xff]  ;;  %v61_v2 = vld [vmem:[#allocation5] sm:$0xff] }
  0x26   :  { %278 = vmatprep.subr.mxu0 %v419_v0  ;;  %282 = vmatprep.mubr.msk.f32.mxu0 %vm420_vm0, %v419_v0  ;;  %v60_v3 = vld [vmem:[#allocation2] sm:$0xff]  ;;  %vm70_vm1 = vcmask 130048   ;;  %v160_v4 = vld [vmem:[#allocation7 + $0x78] sm:$0xff]  ;;  %v159_v5 = vld [vmem:[#allocation7 + $0x70] sm:$0xff]  ;;  %s421_s11 = smov [#allocation8]  }
  0x27   :  { %285 = vmatprep.subr.mxu1 %v419_v0  ;;  %317 = vmatprep.mubr.msk.f32.mxu1 %vm420_vm0, %v419_v0  ;;  %v158_v6 = vld [vmem:[#allocation7 + $0x68] sm:$0xff]  ;;  %v157_v7 = vld [vmem:[#allocation7 + $0x60] sm:$0xff]  ;;  %v156_v8 = vld [vmem:[#allocation7 + $0x58] sm:$0xff]  ;;  %s245_s12 = sshll.u32 %s421_s11, 4  ;;  %s246_s12 = int_to_ptr.vmem [resolvable:$true] %s245_s12 }
  0x28   :  { %279 = vmatpush3.msra.mxu0 %v62_v1  ;;  %286 = vmatpush3.msra.mxu1 %v160_v4  ;;  %v155_v9 = vld [vmem:[#allocation7 + $0x50] sm:$0xff]  ;;  %v154_v10 = vld [vmem:[#allocation7 + $0x48] sm:$0xff]  ;;  %v153_v11 = vld [vmem:[#allocation7 + $0x40] sm:$0xff]  ;;  %s388_s13 = scalar_lea.vmem %s246_s12, 128  ;;  %p393_p2 = scmp.lt.s32.totalorder %s246_s12, %s246_s12 }
  0x29   :  { %280 = vmatprep.subr.mxu0 %v419_v0  ;;  %287 = vmatprep.subr.mxu1 %v419_v0  ;;  %v152_v12 = vld [vmem:[#allocation7 + $0x38] sm:$0xff]  ;;  %v151_v13 = vld [vmem:[#allocation7 + $0x30] sm:$0xff]  ;;  %v150_v14 = vld [vmem:[#allocation7 + $0x28] sm:$0xff]  ;;  %p389_p1 = scmp.ne.s32.totalorder %s246_s12, %s388_s13  ;;  %p394_p3 = scmp.lt.s32.totalorder %s388_s13, %s388_s13 }
  0x2a   :  { %281 = vmatpush3.msra.mxu0 %v61_v2  ;;  %288 = vmatpush3.msra.mxu1 %v159_v5  ;;  %v149_v15 = vld [vmem:[#allocation7 + $0x20] sm:$0xff]  ;;  %v148_v16 = vld [vmem:[#allocation7 + $0x18] sm:$0xff]  ;;  %v147_v17 = vld [vmem:[#allocation7 + $0x10] sm:$0xff] }
  0x2b   :  { %283 = vmatmul.mubr.msk.f32.vlgmr.msra.gmra.mxu0 %vm70_vm1, %v60_v3  ;;  %289 = vmatprep.subr.mxu1 %v419_v0  ;;  %v146_v18 = vld [vmem:[#allocation7 + $0x8] sm:$0xff]  ;;  %v145_v19 = vld [vmem:[#allocation7] sm:$0xff]  ;;  %p395_p4 = por %p394_p3, %p393_p2 }
  0x2c   :  { %290 = vmatpush3.msra.mxu1 %v158_v6  ;;  %v255_v20 = vld [vmem:[%s472_s2] ss:$0 sm:$0xff] }
  0x2d   :  { %291 = vmatprep.subr.mxu1 %v419_v0  ;;  %v257_v25 = vld [vmem:[%s474_s4] ss:$0 sm:$0xff]  ;;  %p396_p5 = pnand %p395_p4, %p389_p1 }
  0x2e   :  { %292 = vmatpush3.msra.mxu1 %v157_v7 }
  0x2f   :  { %293 = vmatprep.subr.mxu1 %v419_v0 }
  0x30   :  { %294 = vmatpush3.msra.mxu1 %v156_v8 }
  0x31   :  { %295 = vmatprep.subr.mxu1 %v419_v0 }
  0x32   :  { %296 = vmatpush3.msra.mxu1 %v155_v9 }
  0x33   :  { %297 = vmatprep.subr.mxu1 %v419_v0 }
  0x34   :  { %298 = vmatpush3.msra.mxu1 %v154_v10 }
  0x35   :  { %299 = vmatprep.subr.mxu1 %v419_v0 }
  0x36   :  { %300 = vmatpush3.msra.mxu1 %v153_v11 }
  0x37   :  { %301 = vmatprep.subr.mxu1 %v419_v0 }
  0x38   :  { %302 = vmatpush3.msra.mxu1 %v152_v12 }
  0x39   :  { %303 = vmatprep.subr.mxu1 %v419_v0 }
  0x3a   :  { %304 = vmatpush3.msra.mxu1 %v151_v13 }
  0x3b   :  { %305 = vmatprep.subr.mxu1 %v419_v0 }
  0x3c   :  { %306 = vmatpush3.msra.mxu1 %v150_v14 }
  0x3d   :  { %307 = vmatprep.subr.mxu1 %v419_v0 }
  0x3e   :  { %308 = vmatpush3.msra.mxu1 %v149_v15 }
  0x3f   :  { %309 = vmatprep.subr.mxu1 %v419_v0 }
  0x40   :  { %310 = vmatpush3.msra.mxu1 %v148_v16 }
  0x41   :  { %311 = vmatprep.subr.mxu1 %v419_v0 }
  0x42   :  { %312 = vmatpush3.msra.mxu1 %v147_v17 }
  0x43   :  { %313 = vmatprep.subr.mxu1 %v419_v0 }
  0x44   :  { %314 = vmatpush3.msra.mxu1 %v146_v18 }
  0x45   :  { %315 = vmatprep.subr.mxu1 %v419_v0 }
  0x46   :  { %316 = vmatpush3.msra.mxu1 %v145_v19 }
  0xeb   :  { %v140_v21 = vpop.f32.mrf.mxu0 }
  0xec   :  { %v141_v22 = vadd.f32 %v255_v20, %v140_v21 }
  0xed   :  { %v284_v23 = vpop.f32.mrf.mxu0 }
  0xee   :  { %v144_v24 = vmax.f32 %v141_v22, 0.0 }
  0xf0   :  { %318 = vmatmul.mubr.f32.vlgmr.msra.gmra.mxu1 %v144_v24 }
 0x1b0   :  { %v234_v26 = vpop.f32.mrf.mxu1 }
 0x1b1   :  { %v235_v27 = vadd.f32 %v257_v25, %v234_v26 }
 0x1b2   :  { %v319_v28 = vpop.f32.mrf.mxu1 }
 0x1b3   :  { %238 = vst [vmem:[#allocation8] sm:$0xff] %v235_v27 }
 0x1b4   :  { %399 = shalt.err (!%p396_p5)
}
 0x1b5   :  { %248 = dma.vmem_to_hbm [thread:$0]  %s246_s12, 128, %s475_s5, [#allocation4]  }
 0x1b6   :  { %412 = dma.done.wait [#allocation4], 128  }
 0x1b7   :  { %413 = vsyncadd [#allocation4], 4294967168 }
 0x1b8   :  { %252 = vsyncpa [#allocation3], 1 }
 0x1b9   :  { %253 = vsyncpa [#allocation6], 1 }
 0x1ba   :  { %254 = vsyncpa [#allocation4], 1 }

</bundles_post_ra>
